<compile_context>
chip_gen: v5e
topology: v5e:2x2
jax: 0.10.0
libtpu: 0.0.40
codegen_flags: <defaults>
</compile_context>

<pallas_src>
import functools

import jax
import jax.numpy as jnp
from jax.experimental import pallas as pl
from jax.experimental.pallas import tpu as pltpu


def _round_up(x, m):
    return (x + m - 1) // m * m


def _k_chunks(k, chunk):
    """Static (start, size) slabs covering [0, k); starts are lane-aligned."""
    chunk = max(128, _round_up(chunk, 128))
    out = []
    s = 0
    while s < k:
        out.append((s, min(chunk, k - s)))
        s += chunk
    return tuple(out)


def _mlp_kernel(num_mid_layers, k_chunks, x_ref, w0_ref, b0_ref, wh_ref,
                bh_ref, wo_ref, bo_ref, o_ref):
    # Layer 0 (Linear): K-chunked contraction.  Each slab of x is cast to
    # bf16 right before its jnp.dot (no monolithic (tb, K) bf16 temp), MXU
    # runs its native bf16 path, accumulation is f32.
    k0, ck = k_chunks[0]
    acc = jnp.dot(x_ref[:, k0:k0 + ck].astype(jnp.bfloat16),
                  w0_ref[k0:k0 + ck, :],
                  preferred_element_type=jnp.float32)
    for k0, ck in k_chunks[1:]:
        acc += jnp.dot(x_ref[:, k0:k0 + ck].astype(jnp.bfloat16),
                       w0_ref[k0:k0 + ck, :],
                       preferred_element_type=jnp.float32)
    h = jnp.maximum(acc + b0_ref[...], 0.0)

    # Hidden layers: Linear + ReLU, statically unrolled (small fixed count).
    # Bias adds use the implicit (1, h_p) broadcast -- no broadcast_to in
    # the loop.
    for l in range(num_mid_layers):
        h = jnp.dot(h.astype(jnp.bfloat16), wh_ref[l],
                    preferred_element_type=jnp.float32)
        h = jnp.maximum(h + bh_ref[l], 0.0)

    # Output layer: Linear only.  Lane-dense (tb, 128) unmasked store.
    out = jnp.dot(h.astype(jnp.bfloat16), wo_ref[...],
                  preferred_element_type=jnp.float32)
    o_ref[...] = (out + bo_ref[...]).astype(o_ref.dtype)


class ModulableNNPallas:
    """JAX/Pallas port of ModulableNN's forward pass."""

    def __init__(self, first_layer_size=3648, num_hidden_layers=5,
                 neurons_per_layer=20, output_size=2, block_batch=None,
                 k_chunk=1024, key=None):
        self.input_size = first_layer_size
        self.num_hidden_layers = num_hidden_layers
        self.neurons_per_layer = neurons_per_layer
        self.output_size = output_size
        # None => pick the per-generation maximum tile at call time.
        self.block_batch = block_batch
        self.k_chunks = _k_chunks(first_layer_size, k_chunk)
        self._gen_tiling = None

        # Padded feature sizes (lane multiples).  The contraction dim of the
        # first layer (input_size) is intentionally NOT padded.
        self.h_p = _round_up(neurons_per_layer, 128)
        self.out_p = _round_up(output_size, 128)
        self.n_mid = num_hidden_layers - 1

        if key is None:
            key = jax.random.PRNGKey(0)
        keys = jax.random.split(key, 2 * (num_hidden_layers + 1))

        def init_linear(kw, kb, fan_in, fan_out):
            # Deterministic synthetic init (uniform, PyTorch-like bound).
            bound = 1.0 / jnp.sqrt(jnp.float32(fan_in))
            w = jax.random.uniform(kw, (fan_in, fan_out), jnp.float32,
                                   -bound, bound)
            b = jax.random.uniform(kb, (fan_out,), jnp.float32, -bound, bound)
            return w, b

        # Layer 0: weight (input_size, h_p) in bf16, bias (1, h_p) in f32.
        w0, b0 = init_linear(keys[0], keys[1], first_layer_size,
                             neurons_per_layer)
        self.w0 = (jnp.zeros((first_layer_size, self.h_p), jnp.float32)
                   .at[:, :neurons_per_layer].set(w0)
                   .astype(jnp.bfloat16))
        self.b0 = (jnp.zeros((1, self.h_p), jnp.float32)
                   .at[0, :neurons_per_layer].set(b0))

        # Middle hidden layers, stacked on a leading axis (bf16 weights).
        n_mid_store = max(self.n_mid, 1)  # keep arrays non-empty
        wh = jnp.zeros((n_mid_store, self.h_p, self.h_p), jnp.float32)
        bh = jnp.zeros((n_mid_store, 1, self.h_p), jnp.float32)
        for l in range(self.n_mid):
            w, b = init_linear(keys[2 + 2 * l], keys[3 + 2 * l],
                               neurons_per_layer, neurons_per_layer)
            wh = wh.at[l, :neurons_per_layer, :neurons_per_layer].set(w)
            bh = bh.at[l, 0, :neurons_per_layer].set(b)
        self.wh = wh.astype(jnp.bfloat16)
        self.bh = bh

        # Output layer.
        wo, bo = init_linear(keys[2 * num_hidden_layers],
                             keys[2 * num_hidden_layers + 1],
                             neurons_per_layer, output_size)
        self.wo = (jnp.zeros((self.h_p, self.out_p), jnp.float32)
                   .at[:neurons_per_layer, :output_size].set(wo)
                   .astype(jnp.bfloat16))
        self.bo = (jnp.zeros((1, self.out_p), jnp.float32)
                   .at[0, :output_size].set(bo))

    def _generation_tiling(self):
        """(max batch tile, scoped VMEM limit) sized per TPU generation."""
        if self._gen_tiling is None:
            try:
                vmem = pltpu.get_tpu_info().vmem_capacity_bytes
            except Exception:
                vmem = 64 * 1024 * 1024  # conservative (v7x-like) fallback
            if vmem >= 100 * 1024 * 1024:
                # v5e / v6e: 128 MiB physical -> big tiles amortize the
                # ~0.35us/step pipeline overhead.
                self._gen_tiling = (2048, 96 * 1024 * 1024)
            else:
                # v7x: 64 MiB per TensorCore -> cap tile & scoped limit.
                self._gen_tiling = (1024, 48 * 1024 * 1024)
        return self._gen_tiling

    def __call__(self, x, return_padded=False):
        # Mirror torch's x.to(float32).view(-1, input_size), but keep bf16
        # inputs as-is: no wrapper-side astype (that would be an extra full
        # HBM round trip); the kernel casts to bf16 in-VMEM either way.
        x = jnp.asarray(x)
        if x.dtype != jnp.bfloat16:
            x = x.astype(jnp.float32)
        x = x.reshape(-1, self.input_size)
        batch = x.shape[0]

        tb_cap, vmem_limit = self._generation_tiling()
        block_batch = self.block_batch if self.block_batch else tb_cap
        block_batch = max(8, min(_round_up(block_batch, 8), tb_cap))

        # Equal-sized batch blocks so the "parallel" grid axis load-balances
        # across v7x's two TensorCores (e.g. 520 -> 264+256, not 512+8);
        # force >=2 blocks for reasonably large batches so the second core
        # is never idle.  Harmless on single-TC v5e/v6e.
        n_blocks = pl.cdiv(batch, block_batch)
        if batch >= 256:
            n_blocks = max(n_blocks, 2)
        tb = max(8, _round_up(pl.cdiv(batch, n_blocks), 8))
        grid_b = pl.cdiv(batch, tb)

        kernel = functools.partial(_mlp_kernel, self.n_mid, self.k_chunks)

        out_p = pl.pallas_call(
            kernel,
            out_shape=jax.ShapeDtypeStruct((batch, self.out_p), jnp.float32),
            grid_spec=pltpu.PrefetchScalarGridSpec(
                num_scalar_prefetch=0,
                grid=(grid_b,),
                in_specs=[
                    # x: full-extent feature dim (exempt from the 128 rule),
                    # batch tiled.  NOTE: the ragged last block reads
                    # out-of-bounds garbage rows of x; this is safe ONLY
                    # because every op here is per-row (no cross-row
                    # reduction) and those output rows are masked on
                    # writeback.  Keep it that way.
                    pl.BlockSpec((tb, self.input_size), lambda i: (i, 0)),
                    # Grid-invariant weights/biases (constant index maps ->
                    # fetched once, resident across the batch loop).
                    pl.BlockSpec((self.input_size, self.h_p),
                                 lambda i: (0, 0)),                     # w0
                    pl.BlockSpec((1, self.h_p), lambda i: (0, 0)),      # b0
                    pl.BlockSpec(self.wh.shape, lambda i: (0, 0, 0)),   # wh
                    pl.BlockSpec(self.bh.shape, lambda i: (0, 0, 0)),   # bh
                    pl.BlockSpec((self.h_p, self.out_p),
                                 lambda i: (0, 0)),                     # wo
                    pl.BlockSpec((1, self.out_p), lambda i: (0, 0)),    # bo
                ],
                out_specs=pl.BlockSpec((tb, self.out_p), lambda i: (i, 0)),
            ),
            compiler_params=pltpu.CompilerParams(
                dimension_semantics=("parallel",),
                vmem_limit_bytes=vmem_limit,
            ),
        )(x, self.w0, self.b0, self.wh, self.bh, self.wo, self.bo)

        if return_padded:
            # Consumers that can read the lane-dense (batch, 128) slab
            # directly skip the extra XLA slice pass below.
            return out_p
        return out_p[:, :self.output_size]

    def reference(self, x):
        """Pure-JAX reference of the same (bf16-weight) forward pass."""
        x = jnp.asarray(x, jnp.float32).reshape(-1, self.input_size)
        n = self.neurons_per_layer
        h = jnp.dot(x.astype(jnp.bfloat16), self.w0[:, :n],
                    preferred_element_type=jnp.float32) + self.b0[0, :n]
        h = jnp.maximum(h, 0.0)
        for l in range(self.n_mid):
            h = jnp.dot(h.astype(jnp.bfloat16), self.wh[l, :n, :n],
                        preferred_element_type=jnp.float32) + self.bh[l, 0, :n]
            h = jnp.maximum(h, 0.0)
        return (jnp.dot(h.astype(jnp.bfloat16),
                        self.wo[:n, :self.output_size],
                        preferred_element_type=jnp.float32)
                + self.bo[0, :self.output_size])


if __name__ == "__main__":
    key = jax.random.PRNGKey(0)
    k_params, k_x = jax.random.split(key)

    # Small shapes consistent with the module (first_layer_size shrunk from
    # 3648 to 256 to keep the example small; same architecture otherwise).
    first_layer_size = 256
    num_hidden_layers = 5
    neurons_per_layer = 20
    output_size = 2
    batch = 12  # non-multiple of the tile to exercise ragged-batch handling

    model = ModulableNNPallas(first_layer_size=first_layer_size,
                              num_hidden_layers=num_hidden_layers,
                              neurons_per_layer=neurons_per_layer,
                              output_size=output_size,
                              k_chunk=128,  # 2 K-chunks: exercises the
                                            # chunked layer-0 path at small K
                              key=k_params)

    x_f32 = jax.random.normal(k_x, (batch, first_layer_size), jnp.float32)
    ref = jax.block_until_ready(model.reference(x_f32))

    # f32 x stream (literal torch x.to(float32) path).
    out_f32 = jax.block_until_ready(model(x_f32))
    assert out_f32.shape == (batch, output_size), out_f32.shape
    assert jnp.allclose(out_f32, ref, atol=2e-2, rtol=2e-2), (
        "Pallas output (f32 x) does not match reference")

    # bf16 x stream (halved HBM traffic; same math, since the matmuls
    # consume bf16 x either way).
    out_bf16 = jax.block_until_ready(model(x_f32.astype(jnp.bfloat16)))
    assert out_bf16.shape == (batch, output_size), out_bf16.shape
    assert jnp.allclose(out_bf16, ref, atol=2e-2, rtol=2e-2), (
        "Pallas output (bf16 x) does not match reference")

    print("KERNEL_OK")
</pallas_src>

<mosaic_0001>
module attributes {stable_mosaic.version = 11 : i64} {
  func.func @_mlp_kernel(%arg0: i32, %arg1: memref<16x256xf32, #tpu.memory_space<vmem>>, %arg2: memref<256x128xbf16, #tpu.memory_space<vmem>>, %arg3: memref<1x128xf32, #tpu.memory_space<vmem>>, %arg4: memref<4x128x128xbf16, #tpu.memory_space<vmem>>, %arg5: memref<4x1x128xf32, #tpu.memory_space<vmem>>, %arg6: memref<128x128xbf16, #tpu.memory_space<vmem>>, %arg7: memref<1x128xf32, #tpu.memory_space<vmem>>, %arg8: memref<16x128xf32, #tpu.memory_space<vmem>>) attributes {dimension_semantics = [#tpu.dimension_semantics<parallel>], iteration_bounds = array<i64: 1>, scalar_prefetch = 0 : i64, scratch_operands = 0 : i64, tpu.core_type = #tpu.core_type<tc>, window_params = [{transform_indices = @transform_0, window_bounds = array<i64: 16, 256>}, {pipeline_mode = #tpu.pipeline_mode<synchronous>, transform_indices = @transform_1, window_bounds = array<i64: 256, 128>}, {pipeline_mode = #tpu.pipeline_mode<synchronous>, transform_indices = @transform_2, window_bounds = array<i64: 1, 128>}, {pipeline_mode = #tpu.pipeline_mode<synchronous>, transform_indices = @transform_3, window_bounds = array<i64: 4, 128, 128>}, {pipeline_mode = #tpu.pipeline_mode<synchronous>, transform_indices = @transform_4, window_bounds = array<i64: 4, 1, 128>}, {pipeline_mode = #tpu.pipeline_mode<synchronous>, transform_indices = @transform_5, window_bounds = array<i64: 128, 128>}, {pipeline_mode = #tpu.pipeline_mode<synchronous>, transform_indices = @transform_6, window_bounds = array<i64: 1, 128>}, {transform_indices = @transform_7, window_bounds = array<i64: 16, 128>}]} {
    %c0 = arith.constant 0 : index
    %c0_0 = arith.constant 0 : index
    %0 = vector.load %arg1[%c0, %c0_0] : memref<16x256xf32, #tpu.memory_space<vmem>>, vector<16x128xf32>
    %1 = arith.truncf %0 : vector<16x128xf32> to vector<16x128xbf16>
    %c0_1 = arith.constant 0 : index
    %c0_2 = arith.constant 0 : index
    %2 = vector.load %arg2[%c0_1, %c0_2] : memref<256x128xbf16, #tpu.memory_space<vmem>>, vector<128x128xbf16>
    %cst = arith.constant dense<0.000000e+00> : vector<16x128xf32>
    %3 = tpu.matmul %1, %2, %cst {dimension_numbers = #tpu.dot_dimension_numbers<[1], [0], [0], [1], [0, 0, 1, 1], [], []>} : vector<16x128xbf16>, vector<128x128xbf16>, vector<16x128xf32> -> vector<16x128xf32>
    %c0_3 = arith.constant 0 : index
    %c128 = arith.constant 128 : index
    %4 = vector.load %arg1[%c0_3, %c128] : memref<16x256xf32, #tpu.memory_space<vmem>>, vector<16x128xf32>
    %5 = arith.truncf %4 : vector<16x128xf32> to vector<16x128xbf16>
    %c128_4 = arith.constant 128 : index
    %c0_5 = arith.constant 0 : index
    %6 = vector.load %arg2[%c128_4, %c0_5] : memref<256x128xbf16, #tpu.memory_space<vmem>>, vector<128x128xbf16>
    %cst_6 = arith.constant dense<0.000000e+00> : vector<16x128xf32>
    %7 = tpu.matmul %5, %6, %cst_6 {dimension_numbers = #tpu.dot_dimension_numbers<[1], [0], [0], [1], [0, 0, 1, 1], [], []>} : vector<16x128xbf16>, vector<128x128xbf16>, vector<16x128xf32> -> vector<16x128xf32>
    %8 = arith.addf %3, %7 : vector<16x128xf32>
    %c0_7 = arith.constant 0 : index
    %c0_8 = arith.constant 0 : index
    %9 = vector.load %arg3[%c0_7, %c0_8] : memref<1x128xf32, #tpu.memory_space<vmem>>, vector<1x128xf32>
    %10 = vector.broadcast %9 : vector<1x128xf32> to vector<16x128xf32>
    %11 = arith.addf %8, %10 : vector<16x128xf32>
    %cst_9 = arith.constant 0.000000e+00 : f32
    %12 = vector.broadcast %cst_9 : f32 to vector<16x128xf32>
    %13 = arith.maximumf %11, %12 : vector<16x128xf32>
    %14 = arith.truncf %13 : vector<16x128xf32> to vector<16x128xbf16>
    %c0_10 = arith.constant 0 : index
    %c0_11 = arith.constant 0 : index
    %c0_12 = arith.constant 0 : index
    %15 = vector.load %arg4[%c0_10, %c0_11, %c0_12] : memref<4x128x128xbf16, #tpu.memory_space<vmem>>, vector<1x128x128xbf16>
    %16 = vector.shape_cast %15 : vector<1x128x128xbf16> to vector<128x128xbf16>
    %cst_13 = arith.constant dense<0.000000e+00> : vector<16x128xf32>
    %17 = tpu.matmul %14, %16, %cst_13 {dimension_numbers = #tpu.dot_dimension_numbers<[1], [0], [0], [1], [0, 0, 1, 1], [], []>} : vector<16x128xbf16>, vector<128x128xbf16>, vector<16x128xf32> -> vector<16x128xf32>
    %c0_14 = arith.constant 0 : index
    %c0_15 = arith.constant 0 : index
    %c0_16 = arith.constant 0 : index
    %18 = vector.load %arg5[%c0_14, %c0_15, %c0_16] : memref<4x1x128xf32, #tpu.memory_space<vmem>>, vector<1x1x128xf32>
    %19 = vector.shape_cast %18 : vector<1x1x128xf32> to vector<1x128xf32>
    %20 = vector.broadcast %19 : vector<1x128xf32> to vector<16x128xf32>
    %21 = arith.addf %17, %20 : vector<16x128xf32>
    %cst_17 = arith.constant 0.000000e+00 : f32
    %22 = vector.broadcast %cst_17 : f32 to vector<16x128xf32>
    %23 = arith.maximumf %21, %22 : vector<16x128xf32>
    %24 = arith.truncf %23 : vector<16x128xf32> to vector<16x128xbf16>
    %c1 = arith.constant 1 : index
    %c0_18 = arith.constant 0 : index
    %c0_19 = arith.constant 0 : index
    %25 = vector.load %arg4[%c1, %c0_18, %c0_19] : memref<4x128x128xbf16, #tpu.memory_space<vmem>>, vector<1x128x128xbf16>
    %26 = vector.shape_cast %25 : vector<1x128x128xbf16> to vector<128x128xbf16>
    %cst_20 = arith.constant dense<0.000000e+00> : vector<16x128xf32>
    %27 = tpu.matmul %24, %26, %cst_20 {dimension_numbers = #tpu.dot_dimension_numbers<[1], [0], [0], [1], [0, 0, 1, 1], [], []>} : vector<16x128xbf16>, vector<128x128xbf16>, vector<16x128xf32> -> vector<16x128xf32>
    %c1_21 = arith.constant 1 : index
    %c0_22 = arith.constant 0 : index
    %c0_23 = arith.constant 0 : index
    %28 = vector.load %arg5[%c1_21, %c0_22, %c0_23] : memref<4x1x128xf32, #tpu.memory_space<vmem>>, vector<1x1x128xf32>
    %29 = vector.shape_cast %28 : vector<1x1x128xf32> to vector<1x128xf32>
    %30 = vector.broadcast %29 : vector<1x128xf32> to vector<16x128xf32>
    %31 = arith.addf %27, %30 : vector<16x128xf32>
    %cst_24 = arith.constant 0.000000e+00 : f32
    %32 = vector.broadcast %cst_24 : f32 to vector<16x128xf32>
    %33 = arith.maximumf %31, %32 : vector<16x128xf32>
    %34 = arith.truncf %33 : vector<16x128xf32> to vector<16x128xbf16>
    %c2 = arith.constant 2 : index
    %c0_25 = arith.constant 0 : index
    %c0_26 = arith.constant 0 : index
    %35 = vector.load %arg4[%c2, %c0_25, %c0_26] : memref<4x128x128xbf16, #tpu.memory_space<vmem>>, vector<1x128x128xbf16>
    %36 = vector.shape_cast %35 : vector<1x128x128xbf16> to vector<128x128xbf16>
    %cst_27 = arith.constant dense<0.000000e+00> : vector<16x128xf32>
    %37 = tpu.matmul %34, %36, %cst_27 {dimension_numbers = #tpu.dot_dimension_numbers<[1], [0], [0], [1], [0, 0, 1, 1], [], []>} : vector<16x128xbf16>, vector<128x128xbf16>, vector<16x128xf32> -> vector<16x128xf32>
    %c2_28 = arith.constant 2 : index
    %c0_29 = arith.constant 0 : index
    %c0_30 = arith.constant 0 : index
    %38 = vector.load %arg5[%c2_28, %c0_29, %c0_30] : memref<4x1x128xf32, #tpu.memory_space<vmem>>, vector<1x1x128xf32>
    %39 = vector.shape_cast %38 : vector<1x1x128xf32> to vector<1x128xf32>
    %40 = vector.broadcast %39 : vector<1x128xf32> to vector<16x128xf32>
    %41 = arith.addf %37, %40 : vector<16x128xf32>
    %cst_31 = arith.constant 0.000000e+00 : f32
    %42 = vector.broadcast %cst_31 : f32 to vector<16x128xf32>
    %43 = arith.maximumf %41, %42 : vector<16x128xf32>
    %44 = arith.truncf %43 : vector<16x128xf32> to vector<16x128xbf16>
    %c3 = arith.constant 3 : index
    %c0_32 = arith.constant 0 : index
    %c0_33 = arith.constant 0 : index
    %45 = vector.load %arg4[%c3, %c0_32, %c0_33] : memref<4x128x128xbf16, #tpu.memory_space<vmem>>, vector<1x128x128xbf16>
    %46 = vector.shape_cast %45 : vector<1x128x128xbf16> to vector<128x128xbf16>
    %cst_34 = arith.constant dense<0.000000e+00> : vector<16x128xf32>
    %47 = tpu.matmul %44, %46, %cst_34 {dimension_numbers = #tpu.dot_dimension_numbers<[1], [0], [0], [1], [0, 0, 1, 1], [], []>} : vector<16x128xbf16>, vector<128x128xbf16>, vector<16x128xf32> -> vector<16x128xf32>
    %c3_35 = arith.constant 3 : index
    %c0_36 = arith.constant 0 : index
    %c0_37 = arith.constant 0 : index
    %48 = vector.load %arg5[%c3_35, %c0_36, %c0_37] : memref<4x1x128xf32, #tpu.memory_space<vmem>>, vector<1x1x128xf32>
    %49 = vector.shape_cast %48 : vector<1x1x128xf32> to vector<1x128xf32>
    %50 = vector.broadcast %49 : vector<1x128xf32> to vector<16x128xf32>
    %51 = arith.addf %47, %50 : vector<16x128xf32>
    %cst_38 = arith.constant 0.000000e+00 : f32
    %52 = vector.broadcast %cst_38 : f32 to vector<16x128xf32>
    %53 = arith.maximumf %51, %52 : vector<16x128xf32>
    %54 = arith.truncf %53 : vector<16x128xf32> to vector<16x128xbf16>
    %c0_39 = arith.constant 0 : index
    %c0_40 = arith.constant 0 : index
    %55 = vector.load %arg6[%c0_39, %c0_40] : memref<128x128xbf16, #tpu.memory_space<vmem>>, vector<128x128xbf16>
    %cst_41 = arith.constant dense<0.000000e+00> : vector<16x128xf32>
    %56 = tpu.matmul %54, %55, %cst_41 {dimension_numbers = #tpu.dot_dimension_numbers<[1], [0], [0], [1], [0, 0, 1, 1], [], []>} : vector<16x128xbf16>, vector<128x128xbf16>, vector<16x128xf32> -> vector<16x128xf32>
    %c0_42 = arith.constant 0 : index
    %c0_43 = arith.constant 0 : index
    %57 = vector.load %arg7[%c0_42, %c0_43] : memref<1x128xf32, #tpu.memory_space<vmem>>, vector<1x128xf32>
    %58 = vector.broadcast %57 : vector<1x128xf32> to vector<16x128xf32>
    %59 = arith.addf %56, %58 : vector<16x128xf32>
    %c0_44 = arith.constant 0 : index
    %c0_45 = arith.constant 0 : index
    %60 = vector.load %arg8[%c0_44, %c0_45] : memref<16x128xf32, #tpu.memory_space<vmem>>, vector<16x128xf32>
    tpu.vector_store %arg8[%c0_44, %c0_45], %59 {strides = array<i32>} : memref<16x128xf32, #tpu.memory_space<vmem>>, vector<16x128xf32>,
    return
  }
  func.func @transform_0(%arg0: i32) -> (i32, i32) {
    %c0_i32 = arith.constant 0 : i32
    %c0_i32_0 = arith.constant 0 : i32
    return %arg0, %c0_i32 : i32, i32
  }
  func.func @transform_1(%arg0: i32) -> (i32, i32) {
    %c0_i32 = arith.constant 0 : i32
    %c0_i32_0 = arith.constant 0 : i32
    %c0_i32_1 = arith.constant 0 : i32
    return %c0_i32, %c0_i32_0 : i32, i32
  }
  func.func @transform_2(%arg0: i32) -> (i32, i32) {
    %c0_i32 = arith.constant 0 : i32
    %c0_i32_0 = arith.constant 0 : i32
    %c0_i32_1 = arith.constant 0 : i32
    return %c0_i32, %c0_i32_0 : i32, i32
  }
  func.func @transform_3(%arg0: i32) -> (i32, i32, i32) {
    %c0_i32 = arith.constant 0 : i32
    %c0_i32_0 = arith.constant 0 : i32
    %c0_i32_1 = arith.constant 0 : i32
    %c0_i32_2 = arith.constant 0 : i32
    return %c0_i32, %c0_i32_0, %c0_i32_1 : i32, i32, i32
  }
  func.func @transform_4(%arg0: i32) -> (i32, i32, i32) {
    %c0_i32 = arith.constant 0 : i32
    %c0_i32_0 = arith.constant 0 : i32
    %c0_i32_1 = arith.constant 0 : i32
    %c0_i32_2 = arith.constant 0 : i32
    return %c0_i32, %c0_i32_0, %c0_i32_1 : i32, i32, i32
  }
  func.func @transform_5(%arg0: i32) -> (i32, i32) {
    %c0_i32 = arith.constant 0 : i32
    %c0_i32_0 = arith.constant 0 : i32
    %c0_i32_1 = arith.constant 0 : i32
    return %c0_i32, %c0_i32_0 : i32, i32
  }
  func.func @transform_6(%arg0: i32) -> (i32, i32) {
    %c0_i32 = arith.constant 0 : i32
    %c0_i32_0 = arith.constant 0 : i32
    %c0_i32_1 = arith.constant 0 : i32
    return %c0_i32, %c0_i32_0 : i32, i32
  }
  func.func @transform_7(%arg0: i32) -> (i32, i32) {
    %c0_i32 = arith.constant 0 : i32
    %c0_i32_0 = arith.constant 0 : i32
    return %arg0, %c0_i32 : i32, i32
  }
}

</mosaic_0001>

<bundles_post_ra>
// kernel: tpu_custom_call.1
= control target key start
LH: loop header
LB: loop body
LE: loop exit
PB: predicated region body
PF: predicated region fallthrough
CT: control target
= control target key end

     0   :  { %12 = vsyncpa [#allocation3], 0  ;;  %s1264_s0 = inlined_call_operand.hbm [shape: f32[12,256], index: 0, kind: input, shape index: {}]   ;;  %s1265_s1 = inlined_call_operand.hbm [shape: bf16[256,128], index: 1, kind: input, shape index: {}]   ;;  %s1266_s2 = inlined_call_operand.vmem [shape: f32[1,128], index: 2, kind: input, shape index: {}]   ;;  %s1267_s3 = inlined_call_operand.hbm [shape: bf16[4,128,128], index: 3, kind: input, shape index: {}]   ;;  %s1268_s4 = inlined_call_operand.hbm [shape: f32[4,1,128], index: 4, kind: input, shape index: {}]   ;;  %s1269_s5 = inlined_call_operand.hbm [shape: bf16[128,128], index: 5, kind: input, shape index: {}]   ;;  %s1270_s6 = inlined_call_operand.vmem [shape: f32[1,128], index: 6, kind: input, shape index: {}]   ;;  %s1271_s7 = inlined_call_operand.hbm [shape: f32[12,128], index: 7, kind: output, shape index: {}]  }
   0x1   :  { %13 = vsyncpa [#allocation6], 0 }
   0x2   :  { %14 = vsyncpa [#allocation9], 0  ;;  %s33_s26 = sshll.u32 %s1265_s1, 4  ;;  %s34_s26 = int_to_ptr.hbm [resolvable:$true] %s33_s26 }
   0x3   :  { %15 = vsyncpa [#allocation4], 0  ;;  %s1178_s27 = smov [#allocation5]   ;;  %s1179_s29 = smov 64  }
   0x4   :  { %s35_s28 = sshll.u32 %s1178_s27, 4  ;;  %s1180_s30 = smov 4   ;;  %s36_s28 = int_to_ptr.vmem [resolvable:$true] %s35_s28 }
   0x5   :  { %41 = dma.hbm_to_vmem [thread:$0]  %s34_s26, 2048, %s36_s28, [#allocation6], %s1179_s29, %s1179_s29, %s1180_s30  }
   0x6   :  { %s61_s10 = sshll.u32 %s1268_s4, 4  ;;  %s1181_s11 = smov [#allocation8]   ;;  %s62_s10 = int_to_ptr.hbm [resolvable:$true] %s61_s10 }
   0x7   :  { %s63_s12 = sshll.u32 %s1181_s11, 4  ;;  %s1182_s1 = smov 16   ;;  %s64_s12 = int_to_ptr.vmem [resolvable:$true] %s63_s12 }
   0x8   :  { %s1183_s13 = smov 1   ;;  %s20_s16 = sshll.u32 %s1264_s0, 4  ;;  %s21_s16 = int_to_ptr.hbm [resolvable:$true] %s20_s16 }
   0x9   :  { %69 = dma.hbm_to_vmem [thread:$0]  %s62_s10, 64, %s64_s12, [#allocation9], %s1182_s1, %s1182_s1, %s1183_s13  }
   0xa   :  { %s1184_s17 = smov [#allocation2]   ;;  %s1185_s19 = smov 256  }
   0xb   :  { %s22_s18 = sshll.u32 %s1184_s17, 4  ;;  %s48_s4 = sshll.u32 %s1267_s3, 4  ;;  %s23_s18 = int_to_ptr.vmem [resolvable:$true] %s22_s18  ;;  %s49_s4 = int_to_ptr.hbm [resolvable:$true] %s48_s4 }
   0xc   :  { %28 = dma.hbm_to_vmem [thread:$0]  %s21_s16, 512, %s23_s18, [#allocation3], %s1185_s19, %s1185_s19, %s1182_s1  }
   0xd   :  { %s1186_s22 = smov [#allocation7]   ;;  %s74_s26 = sshll.u32 %s1269_s5, 4  ;;  %s75_s26 = int_to_ptr.hbm [resolvable:$true] %s74_s26 }
   0xe   :  { %s50_s23 = sshll.u32 %s1186_s22, 4  ;;  %s1187_s0 = smov [#allocation10]   ;;  %s51_s23 = int_to_ptr.vmem [resolvable:$true] %s50_s23 }
   0xf   :  { %56 = dma.hbm_to_vmem [thread:$0]  %s49_s4, 4096, %s51_s23, [#allocation6], %s1179_s29, %s1179_s29, %s1180_s30  }
  0x10   :  { %s76_s27 = sshll.u32 %s1187_s0, 4  ;;  %s77_s27 = int_to_ptr.vmem [resolvable:$true] %s76_s27 }
  0x11   :  { %82 = dma.hbm_to_vmem [thread:$0]  %s75_s26, 1024, %s77_s27, [#allocation9], %s1179_s29, %s1179_s29, %s1180_s30  }
  0x12   :  { %1170 = dma.done.wait [#allocation3], 512  }
  0x13   :  { %1171 = vsyncadd [#allocation3], 4294966784 }
  0x14   :  { %1172 = dma.done.wait [#allocation6], 6144  }
  0x15   :  { %1173 = vsyncadd [#allocation6], 4294961152 }
  0x16   :  { %1174 = dma.done.wait [#allocation9], 1088  }
  0x17   :  { %1175 = vsyncadd [#allocation9], 4294966208  ;;  %v966_v0 = vld [vmem:[#allocation5 + $0x78] sm:$0xff]  ;;  %v965_v2 = vld [vmem:[#allocation5 + $0x70] sm:$0xff]  ;;  %s1188_s29 = smov [#allocation11]   ;;  %s712_s10 = sshll.u32 %s1271_s7, 4  ;;  %s713_s10 = int_to_ptr.hbm [resolvable:$true] %s712_s10 }
  0x18   :  { %v958_v1 = vld [vmem:[#allocation5 + $0x38] sm:$0xff]  ;;  %191 = vmatpush.bf16.msra.mxu0 %v966_v0  ;;  %v957_v3 = vld [vmem:[#allocation5 + $0x30] sm:$0xff]  ;;  %v964_v4 = vld [vmem:[#allocation5 + $0x68] sm:$0xff]  ;;  %s710_s30 = sshll.u32 %s1188_s29, 4  ;;  %s1189_s11 = smov 128   ;;  %s711_s30 = int_to_ptr.vmem [resolvable:$true] %s710_s30 }
  0x19   :  { %253 = vmatpush.bf16.msra.mxu1 %v958_v1  ;;  %v956_v5 = vld [vmem:[#allocation5 + $0x28] sm:$0xff]  ;;  %v974_v6 = vld [vmem:[#allocation7 + $0x38] sm:$0xff]  ;;  %v973_v7 = vld [vmem:[#allocation7 + $0x30] sm:$0xff]  ;;  %s1190_s12 = smov 8  }
  0x1a   :  { %344 = vmatpush.bf16.msra.mxu2 %v974_v6  ;;  %v963_v8 = vld [vmem:[#allocation5 + $0x60] sm:$0xff]  ;;  %v972_v10 = vld [vmem:[#allocation7 + $0x28] sm:$0xff]  ;;  %v962_v11 = vld [vmem:[#allocation5 + $0x58] sm:$0xff] }
  0x1b   :  { %v955_v9 = vld [vmem:[#allocation5 + $0x20] sm:$0xff]  ;;  %v954_v12 = vld [vmem:[#allocation5 + $0x18] sm:$0xff]  ;;  %v961_v14 = vld [vmem:[#allocation5 + $0x50] sm:$0xff] }
  0x1c   :  { %192 = vmatpush.bf16.msra.mxu0 %v965_v2  ;;  %v971_v13 = vld [vmem:[#allocation7 + $0x20] sm:$0xff]  ;;  %v953_v15 = vld [vmem:[#allocation5 + $0x10] sm:$0xff]  ;;  %v960_v16 = vld [vmem:[#allocation5 + $0x48] sm:$0xff] }
  0x1d   :  { %254 = vmatpush.bf16.msra.mxu1 %v957_v3  ;;  %v952_v17 = vld [vmem:[#allocation5 + $0x8] sm:$0xff]  ;;  %v959_v18 = vld [vmem:[#allocation5 + $0x40] sm:$0xff]  ;;  %v125_v21 = vld [vmem:[#allocation2 + $0x18] sm:$0xff] }
  0x1e   :  { %345 = vmatpush.bf16.msra.mxu2 %v973_v7  ;;  %v951_v19 = vld [vmem:[#allocation5] sm:$0xff]  ;;  %v124_v20 = vld [vmem:[#allocation2 + $0x8] sm:$0xff]  ;;  %v106_v23 = vld [vmem:[#allocation2 + $0x10] sm:$0xff] }
  0x1f   :  { %v105_v22 = vld [vmem:[#allocation2] sm:$0xff]  ;;  %v126_v24 = vpack.c.bf16 %v125_v21, %v124_v20  ;;  %v970_v26 = vld [vmem:[#allocation7 + $0x18] sm:$0xff]  ;;  %v969_v27 = vld [vmem:[#allocation7 + $0x10] sm:$0xff] }
  0x20   :  { %193 = vmatpush.bf16.msra.mxu0 %v964_v4  ;;  %v107_v25 = vpack.c.bf16 %v106_v23, %v105_v22  ;;  %v968_v28 = vld [vmem:[#allocation7 + $0x8] sm:$0xff]  ;;  %v967_v29 = vld [vmem:[#allocation7] sm:$0xff]  ;;  %v982_v30 = vld [vmem:[#allocation7 + $0x78] sm:$0xff] }
  0x21   :  { %255 = vmatpush.bf16.msra.mxu1 %v956_v5  ;;  %431 = vmatpush.bf16.msra.mxu3 %v982_v30  ;;  %v981_v31 = vld [vmem:[#allocation7 + $0x70] sm:$0xff]  ;;  %v980_v32 = vld [vmem:[#allocation7 + $0x68] sm:$0xff]  ;;  %v979_v33 = vld [vmem:[#allocation7 + $0x60] sm:$0xff] }
  0x22   :  { %346 = vmatpush.bf16.msra.mxu2 %v972_v10  ;;  %v1020_v37 = vld [vmem:[%s1266_s2] ss:$0 sm:$0xff]  ;;  %v978_v46 = vld [vmem:[#allocation7 + $0x58] sm:$0xff]  ;;  %v977_v47 = vld [vmem:[#allocation7 + $0x50] sm:$0xff] }
  0x23   :  { %v976_v48 = vld [vmem:[#allocation7 + $0x48] sm:$0xff]  ;;  %v975_v49 = vld [vmem:[#allocation7 + $0x40] sm:$0xff]  ;;  %v990_v50 = vld [vmem:[#allocation7 + $0xb8] sm:$0xff] }
  0x24   :  { %194 = vmatpush.bf16.msra.mxu0 %v963_v8  ;;  %v989_v51 = vld [vmem:[#allocation7 + $0xb0] sm:$0xff]  ;;  %v988_v52 = vld [vmem:[#allocation7 + $0xa8] sm:$0xff]  ;;  %v987_v53 = vld [vmem:[#allocation7 + $0xa0] sm:$0xff] }
  0x25   :  { %256 = vmatpush.bf16.msra.mxu1 %v955_v9  ;;  %432 = vmatpush.bf16.msra.mxu3 %v981_v31  ;;  %v1021_v55 = vld [vmem:[#allocation8] ss:$0 sm:$0xff]  ;;  %v986_v62 = vld [vmem:[#allocation7 + $0x98] sm:$0xff]  ;;  %v985_v63 = vld [vmem:[#allocation7 + $0x90] sm:$0xff] }
  0x26   :  { %347 = vmatpush.bf16.msra.mxu2 %v971_v13  ;;  %v984_v0 = vld [vmem:[#allocation7 + $0x88] sm:$0xff]  ;;  %v983_v1 = vld [vmem:[#allocation7 + $0x80] sm:$0xff]  ;;  %v998_v2 = vld [vmem:[#allocation7 + $0xf8] sm:$0xff] }
  0x27   :  { %v997_v3 = vld [vmem:[#allocation7 + $0xf0] sm:$0xff]  ;;  %v996_v4 = vld [vmem:[#allocation7 + $0xe8] sm:$0xff]  ;;  %v995_v5 = vld [vmem:[#allocation7 + $0xe0] sm:$0xff] }
  0x28   :  { %195 = vmatpush.bf16.msra.mxu0 %v962_v11  ;;  %v1022_v7 = vld [vmem:[#allocation8 + $0x1] ss:$0 sm:$0xff]  ;;  %v1004_v20 = vld [vmem:[#allocation10 + $0x28] sm:$0xff]  ;;  %v1003_v21 = vld [vmem:[#allocation10 + $0x20] sm:$0xff] }
  0x29   :  { %257 = vmatpush.bf16.msra.mxu1 %v954_v12  ;;  %433 = vmatpush.bf16.msra.mxu3 %v980_v32  ;;  %v1023_v23 = vld [vmem:[#allocation8 + $0x2] ss:$0 sm:$0xff]  ;;  %v1001_v31 = vld [vmem:[#allocation10 + $0x10] sm:$0xff]  ;;  %v1000_v32 = vld [vmem:[#allocation10 + $0x8] sm:$0xff] }
  0x2a   :  { %348 = vmatpush.bf16.msra.mxu2 %v970_v26  ;;  %v1002_v30 = vld [vmem:[#allocation10 + $0x18] sm:$0xff] }
  0x2c   :  { %196 = vmatpush.bf16.msra.mxu0 %v961_v14  ;;  %v994_v14 = vld [vmem:[#allocation7 + $0xd8] sm:$0xff] }
  0x2d   :  { %258 = vmatpush.bf16.msra.mxu1 %v953_v15  ;;  %434 = vmatpush.bf16.msra.mxu3 %v979_v33  ;;  %v993_v15 = vld [vmem:[#allocation7 + $0xd0] sm:$0xff]  ;;  %v999_v33 = vld [vmem:[#allocation10] sm:$0xff] }
  0x2e   :  { %349 = vmatpush.bf16.msra.mxu2 %v969_v27 }
  0x30   :  { %197 = vmatpush.bf16.msra.mxu0 %v960_v16  ;;  %v992_v16 = vld [vmem:[#allocation7 + $0xc8] sm:$0xff] }
  0x31   :  { %259 = vmatpush.bf16.msra.mxu1 %v952_v17  ;;  %435 = vmatpush.bf16.msra.mxu3 %v978_v46  ;;  %v991_v17 = vld [vmem:[#allocation7 + $0xc0] sm:$0xff] }
  0x32   :  { %350 = vmatpush.bf16.msra.mxu2 %v968_v28 }
  0x34   :  { %198 = vmatpush.bf16.msra.mxu0 %v959_v18  ;;  %v1006_v18 = vld [vmem:[#allocation10 + $0x38] sm:$0xff] }
  0x35   :  { %260 = vmatpush.bf16.msra.mxu1 %v951_v19  ;;  %436 = vmatpush.bf16.msra.mxu3 %v977_v47  ;;  %v1005_v19 = vld [vmem:[#allocation10 + $0x30] sm:$0xff] }
  0x36   :  { %351 = vmatpush.bf16.msra.mxu2 %v967_v29 }
  0x37   :  { %199 = vmatmul.bf16.vlgmr.msra.gmra.mxu0 %v126_v24 }
  0x38   :  { %261 = vmatmul.bf16.vlgmr.msra.gmra.mxu1 %v107_v25  ;;  %518 = vmatpush.bf16.msrb.mxu0 %v990_v50 }
  0x39   :  { %437 = vmatpush.bf16.msra.mxu3 %v976_v48  ;;  %605 = vmatpush.bf16.msrb.mxu1 %v998_v2 }
  0x3a   :  { %690 = vmatpush.bf16.msrb.mxu2 %v1006_v18 }
  0x3c   :  { %519 = vmatpush.bf16.msrb.mxu0 %v989_v51 }
  0x3d   :  { %438 = vmatpush.bf16.msra.mxu3 %v975_v49  ;;  %606 = vmatpush.bf16.msrb.mxu1 %v997_v3 }
  0x3e   :  { %691 = vmatpush.bf16.msrb.mxu2 %v1005_v19 }
  0x40   :  { %520 = vmatpush.bf16.msrb.mxu0 %v988_v52 }
  0x41   :  { %607 = vmatpush.bf16.msrb.mxu1 %v996_v4 }
  0x42   :  { %692 = vmatpush.bf16.msrb.mxu2 %v1004_v20 }
  0x44   :  { %521 = vmatpush.bf16.msrb.mxu0 %v987_v53 }
  0x45   :  { %608 = vmatpush.bf16.msrb.mxu1 %v995_v5 }
  0x46   :  { %693 = vmatpush.bf16.msrb.mxu2 %v1003_v21 }
  0x48   :  { %522 = vmatpush.bf16.msrb.mxu0 %v986_v62 }
  0x49   :  { %609 = vmatpush.bf16.msrb.mxu1 %v994_v14 }
  0x4a   :  { %694 = vmatpush.bf16.msrb.mxu2 %v1002_v30 }
  0x4c   :  { %523 = vmatpush.bf16.msrb.mxu0 %v985_v63 }
  0x4d   :  { %610 = vmatpush.bf16.msrb.mxu1 %v993_v15 }
  0x4e   :  { %695 = vmatpush.bf16.msrb.mxu2 %v1001_v31 }
  0x50   :  { %524 = vmatpush.bf16.msrb.mxu0 %v984_v0 }
  0x51   :  { %611 = vmatpush.bf16.msrb.mxu1 %v992_v16 }
  0x52   :  { %696 = vmatpush.bf16.msrb.mxu2 %v1000_v32 }
  0x54   :  { %525 = vmatpush.bf16.msrb.mxu0 %v983_v1 }
  0x55   :  { %612 = vmatpush.bf16.msrb.mxu1 %v991_v17 }
  0x56   :  { %697 = vmatpush.bf16.msrb.mxu2 %v999_v33 }
  0xb4   :  { %v200_v34 = vpop.f32.mrf.mxu0 }
  0xb5   :  { %v262_v35 = vpop.f32.mrf.mxu1 }
  0xb6   :  { %v263_v36 = vadd.f32 %v262_v35, %v200_v34  ;;  %v1024_v35 = vld [vmem:[#allocation8 + $0x3] ss:$0 sm:$0xff] }
  0xb8   :  { %v271_v40 = vadd.f32 %v1020_v37, %v263_v36 }
  0xba   :  { %v273_v43 = vmax.f32 %v271_v40, 0.0 }
  0xbc   :  { %v202_v38 = vpop.f32.mrf.mxu0 }
  0xbd   :  { %v264_v39 = vpop.f32.mrf.mxu1 }
  0xbe   :  { %v265_v41 = vadd.f32 %v264_v39, %v202_v38 }
  0xc0   :  { %v272_v42 = vadd.f32 %v1020_v37, %v265_v41 }
  0xc2   :  { %v274_v44 = vmax.f32 %v272_v42, 0.0  ;;  %v1025_v42 = vld [vmem:[%s1270_s6] ss:$0 sm:$0xff] }
  0xc4   :  { %v275_v45 = vpack.c.bf16 %v274_v44, %v273_v43 }
  0xc6   :  { %352 = vmatmul.bf16.vlgmr.msra.gmra.mxu2 %v275_v45 }
 0x149   :  { %v353_v54 = vpop.f32.mrf.mxu2 }
 0x14a   :  { %v354_v56 = vadd.f32 %v1021_v55, %v353_v54 }
 0x14c   :  { %v358_v59 = vmax.f32 %v354_v56, 0.0 }
 0x151   :  { %v355_v57 = vpop.f32.mrf.mxu2 }
 0x152   :  { %v356_v58 = vadd.f32 %v1021_v55, %v355_v57 }
 0x154   :  { %v359_v60 = vmax.f32 %v356_v58, 0.0 }
 0x156   :  { %v360_v61 = vpack.c.bf16 %v359_v60, %v358_v59 }
 0x158   :  { %439 = vmatmul.bf16.vlgmr.msra.gmra.mxu3 %v360_v61 }
 0x1db   :  { %v440_v6 = vpop.f32.mrf.mxu3 }
 0x1dc   :  { %v441_v8 = vadd.f32 %v1022_v7, %v440_v6 }
 0x1de   :  { %v445_v11 = vmax.f32 %v441_v8, 0.0 }
 0x1e3   :  { %v442_v9 = vpop.f32.mrf.mxu3 }
 0x1e4   :  { %v443_v10 = vadd.f32 %v1022_v7, %v442_v9 }
 0x1e6   :  { %v446_v12 = vmax.f32 %v443_v10, 0.0 }
 0x1e8   :  { %v447_v13 = vpack.c.bf16 %v446_v12, %v445_v11 }
 0x1ea   :  { %526 = vmatmul.bf16.vlgmr.msrb.gmra.mxu0 %v447_v13 }
 0x267   :  { %v527_v22 = vpop.f32.mrf.mxu0 }
 0x268   :  { %v528_v24 = vadd.f32 %v1023_v23, %v527_v22 }
 0x26a   :  { %v532_v27 = vmax.f32 %v528_v24, 0.0 }
 0x26f   :  { %v529_v25 = vpop.f32.mrf.mxu0 }
 0x270   :  { %v530_v26 = vadd.f32 %v1023_v23, %v529_v25 }
 0x272   :  { %v533_v28 = vmax.f32 %v530_v26, 0.0 }
 0x274   :  { %v534_v29 = vpack.c.bf16 %v533_v28, %v532_v27 }
 0x276   :  { %613 = vmatmul.bf16.vlgmr.msrb.gmra.mxu1 %v534_v29 }
 0x2f3   :  { %v614_v34 = vpop.f32.mrf.mxu1 }
 0x2f4   :  { %v615_v36 = vadd.f32 %v1024_v35, %v614_v34 }
 0x2f6   :  { %v619_v39 = vmax.f32 %v615_v36, 0.0 }
 0x2fb   :  { %v616_v37 = vpop.f32.mrf.mxu1 }
 0x2fc   :  { %v617_v38 = vadd.f32 %v1024_v35, %v616_v37 }
 0x2fe   :  { %v620_v40 = vmax.f32 %v617_v38, 0.0 }
 0x300   :  { %v621_v41 = vpack.c.bf16 %v620_v40, %v619_v39 }
 0x302   :  { %698 = vmatmul.bf16.vlgmr.msrb.gmra.mxu2 %v621_v41 }
 0x385   :  { %v699_v43 = vpop.f32.mrf.mxu2 }
 0x386   :  { %v700_v44 = vadd.f32 %v1025_v42, %v699_v43 }
 0x388   :  { %704 = vst [vmem:[#allocation11] sm:$0xff] %v700_v44 }
 0x38d   :  { %v701_v45 = vpop.f32.mrf.mxu2 }
 0x38e   :  { %v702_v46 = vadd.f32 %v1025_v42, %v701_v45 }
 0x390   :  { %705 = vst [vmem:[#allocation11 + $0x8] sm:$0xff] %v702_v46 }
 0x391   :  { %718 = dma.vmem_to_hbm [thread:$0]  %s711_s30, 256, %s713_s10, [#allocation4], %s1189_s11, %s1189_s11, %s1190_s12  }
 0x392   :  { %1176 = dma.done.wait [#allocation4], 256  }
 0x393   :  { %1177 = vsyncadd [#allocation4], 4294967040 }
 0x394   :  { %723 = vsyncpa [#allocation3], 1 }
 0x395   :  { %724 = vsyncpa [#allocation6], 1 }
 0x396   :  { %725 = vsyncpa [#allocation9], 1 }
 0x397   :  { %726 = vsyncpa [#allocation4], 1 }

</bundles_post_ra>
